<compile_context>
chip_gen: v5e
topology: v5e:2x2
jax: 0.10.0
libtpu: 0.0.40
codegen_flags: <defaults>
</compile_context>

<pallas_src>
import functools

import jax
import jax.numpy as jnp
from jax import lax
from jax.experimental import pallas as pl
from jax.experimental.pallas import tpu as pltpu


def _round_up(x, m):
    return -(-x // m) * m


def _cdiv(a, b):
    return -(-a // b)


@functools.lru_cache(maxsize=None)
def _vmem_capacity_bytes():
    """Physical VMEM per TensorCore; conservative (v7x-like) fallback."""
    try:
        return int(getattr(pltpu.get_tpu_info(), "vmem_capacity_bytes"))
    except Exception:
        return 64 << 20


def _vmem_budgets():
    """(input double-buffer budget, scoped vmem_limit_bytes), generation-aware."""
    cap = _vmem_capacity_bytes()
    if cap <= (80 << 20):            # v7x: 64 MiB per TensorCore, 2 TCs/chip
        return 24 << 20, 32 << 20
    return 32 << 20, 42 << 20        # v5e / v6e: 128 MiB physical VMEM


def _choose_bn(n, feat, budget):
    """Row tile: as large as the double-buffered VMEM budget allows (capped at
    2048 rows), a multiple of 8 (sublane), balanced across tiles so ragged
    batches waste <= 7 padded rows per tile, and >= 2 grid steps whenever the
    batch allows it (v7x megacore)."""
    row_bytes = feat * 4                                  # f32 slab row
    cap = max(8, (budget // (2 * row_bytes)) // 8 * 8)    # 2 pipeline buffers
    bn_max = min(2048, cap)
    n8 = _round_up(n, 8)
    if n8 < 16:
        return n8
    tiles = max(2, _cdiv(n8, bn_max))
    return _round_up(_cdiv(n8, tiles), 8)


def _score_kernel(dim, slab_ref, o_ref):
    # slab layout along lanes: [ h+rel | offs | t ], each `dim` wide.
    x = slab_ref[...]                              # (bn, 3*dim) f32, one dense load
    hr = x[:, 0 * dim:1 * dim]                     # h + rel (folded in wrapper)
    offs = x[:, 1 * dim:2 * dim]                   # (r_typ + 1) * off (folded)
    t = x[:, 2 * dim:3 * dim]

    d = hr - offs
    prod = (1.0 / 1024.0) * (d * d) + offs

    # cosine similarity along the feature axis (PyTorch eps = 1e-8):
    #   max(sqrt(a), eps) * max(sqrt(b), eps) == sqrt(max(a, eps^2) * max(b, eps^2))
    num = jnp.sum(prod * t, axis=1, keepdims=True)
    pn2 = jnp.sum(prod * prod, axis=1, keepdims=True)
    tn2 = jnp.sum(t * t, axis=1, keepdims=True)
    eps2 = jnp.float32(1e-16)
    inv = lax.rsqrt(jnp.maximum(pn2, eps2) * jnp.maximum(tn2, eps2))
    o_ref[...] = -(num * inv)


@functools.partial(jax.jit, static_argnames=("dim",))
def model_forward(ent_emb, rel_emb, h_ids, r_typ, t_ids, *, dim):
    """Equivalent of Model.forward.  Returns (n,) f32 scores."""
    n = h_ids.shape[0]
    feat = 3 * dim

    budget, vmem_limit = _vmem_budgets()
    bn = _choose_bn(n, feat, budget)
    n_pad = _round_up(n, bn)

    # Pad the *ids* (not the slab) so the gather/concat fusion directly
    # produces a padded slab; pad rows (id 0, r_typ 0) give finite scores
    # that are sliced off below.
    if n_pad != n:
        pad = n_pad - n
        h_ids = jnp.pad(h_ids, (0, pad))
        t_ids = jnp.pad(t_ids, (0, pad))
        r_typ = jnp.pad(r_typ, (0, pad))

    # --- embedding gathers + elementwise folds (plain-JAX glue; XLA fuses
    #     these directly into the concatenated slab write) ---
    h = ent_emb[h_ids]                                   # (n_pad, d)
    t = ent_emb[t_ids]                                   # (n_pad, d)
    r_ids = r_typ * (dim + 1)
    rel = rel_emb[r_ids]                                 # (n_pad, d)
    off = rel_emb[r_ids + 1]                             # (n_pad, d)
    offs = (r_typ + 1).astype(jnp.float32)[:, None] * off
    hr = h + rel
    slab = jnp.concatenate([hr, offs, t], axis=1).astype(jnp.float32)  # (n_pad, 3d)

    cost = pl.CostEstimate(
        flops=int(n_pad) * (11 * int(dim) + 8),
        transcendentals=int(n_pad),
        bytes_accessed=int(n_pad) * (feat * 4 + 4),
    )

    out = pl.pallas_call(
        functools.partial(_score_kernel, dim),
        out_shape=jax.ShapeDtypeStruct((n_pad, 1), jnp.float32),
        grid=(n_pad // bn,),
        in_specs=[pl.BlockSpec((bn, feat), lambda i: (i, 0))],
        out_specs=pl.BlockSpec((bn, 1), lambda i: (i, 0)),
        compiler_params=pltpu.CompilerParams(
            dimension_semantics=("parallel",),
            vmem_limit_bytes=int(vmem_limit)),
        cost_estimate=cost,
    )(slab)
    return out[:n, 0]


def _reference(ent_emb, rel_emb, h_ids, r_typ, t_ids, dim):
    h = ent_emb[h_ids]
    t = ent_emb[t_ids]
    r_ids = r_typ * (dim + 1)
    rel = rel_emb[r_ids]
    off = rel_emb[r_ids + 1]
    offs = (r_typ + 1).astype(jnp.float32)[:, None] * off
    x = h + rel
    prod = (1.0 / 1024.0) * (x - offs) ** 2 + offs
    eps = 1e-8
    num = jnp.sum(prod * t, axis=1)
    den = jnp.maximum(jnp.linalg.norm(prod, axis=1), eps) * \
          jnp.maximum(jnp.linalg.norm(t, axis=1), eps)
    return -(num / den)


if __name__ == "__main__":
    # Small, deterministic synthetic setup consistent with the module.
    ent_n, rel_n, dim = 256, 8, 32

    key = jax.random.PRNGKey(0)
    k1, k2 = jax.random.split(key, 2)
    # torch.nn.Embedding default init: N(0, 1)
    ent_emb = jax.random.normal(k1, (ent_n, dim), dtype=jnp.float32)
    rel_emb = jax.random.normal(k2, (rel_n * (dim + 1), dim), dtype=jnp.float32)

    # n=8: single whole-batch tile; n=13: exercises id padding + 2-step grid.
    for n in (8, 13):
        kk = jax.random.fold_in(key, n)
        ka, kb, kc = jax.random.split(kk, 3)
        h_ids = jax.random.randint(ka, (n,), 0, ent_n, dtype=jnp.int32)
        t_ids = jax.random.randint(kb, (n,), 0, ent_n, dtype=jnp.int32)
        r_typ = jax.random.randint(kc, (n,), 0, rel_n, dtype=jnp.int32)

        out = model_forward(ent_emb, rel_emb, h_ids, r_typ, t_ids, dim=dim)
        out = jax.block_until_ready(out)

        ref = _reference(ent_emb, rel_emb, h_ids, r_typ, t_ids, dim)
        assert out.shape == (n,)
        assert jnp.allclose(out, ref, atol=1e-5, rtol=1e-5), (n, out, ref)

    print("KERNEL_OK")
</pallas_src>

<mosaic_0001>
module attributes {stable_mosaic.version = 11 : i64} {
  func.func @_score_kernel(%arg0: i32, %arg1: memref<8x96xf32, #tpu.memory_space<vmem>>, %arg2: memref<8x1xf32, #tpu.memory_space<vmem>>) attributes {dimension_semantics = [#tpu.dimension_semantics<parallel>], iteration_bounds = array<i64: 1>, scalar_prefetch = 0 : i64, scratch_operands = 0 : i64, tpu.core_type = #tpu.core_type<tc>, window_params = [{transform_indices = @transform_0, window_bounds = array<i64: 8, 96>}, {transform_indices = @transform_1, window_bounds = array<i64: 8, 1>}]} {
    %c0 = arith.constant 0 : index
    %c0_0 = arith.constant 0 : index
    %0 = vector.load %arg1[%c0, %c0_0] : memref<8x96xf32, #tpu.memory_space<vmem>>, vector<8x96xf32>
    %1 = vector.extract_strided_slice %0 {offsets = [0, 0], sizes = [8, 32], strides = [1, 1]} : vector<8x96xf32> to vector<8x32xf32>
    %2 = vector.extract_strided_slice %0 {offsets = [0, 32], sizes = [8, 32], strides = [1, 1]} : vector<8x96xf32> to vector<8x32xf32>
    %3 = vector.extract_strided_slice %0 {offsets = [0, 64], sizes = [8, 32], strides = [1, 1]} : vector<8x96xf32> to vector<8x32xf32>
    %4 = arith.subf %1, %2 : vector<8x32xf32>
    %5 = arith.mulf %4, %4 : vector<8x32xf32>
    %cst = arith.constant 9.765625E-4 : f32
    %6 = vector.broadcast %cst : f32 to vector<8x32xf32>
    %7 = arith.mulf %6, %5 : vector<8x32xf32>
    %8 = arith.addf %7, %2 : vector<8x32xf32>
    %9 = arith.mulf %8, %3 : vector<8x32xf32>
    %cst_1 = arith.constant dense<0.000000e+00> : vector<8xf32>
    %10 = vector.multi_reduction <add>, %9, %cst_1 [1] : vector<8x32xf32> to vector<8xf32>
    %11 = vector.shape_cast %10 : vector<8xf32> to vector<8x1xf32>
    %12 = arith.mulf %8, %8 : vector<8x32xf32>
    %cst_2 = arith.constant dense<0.000000e+00> : vector<8xf32>
    %13 = vector.multi_reduction <add>, %12, %cst_2 [1] : vector<8x32xf32> to vector<8xf32>
    %14 = vector.shape_cast %13 : vector<8xf32> to vector<8x1xf32>
    %15 = arith.mulf %3, %3 : vector<8x32xf32>
    %cst_3 = arith.constant dense<0.000000e+00> : vector<8xf32>
    %16 = vector.multi_reduction <add>, %15, %cst_3 [1] : vector<8x32xf32> to vector<8xf32>
    %17 = vector.shape_cast %16 : vector<8xf32> to vector<8x1xf32>
    %cst_4 = arith.constant 1.000000e-16 : f32
    %18 = vector.broadcast %cst_4 : f32 to vector<8x1xf32>
    %19 = arith.maximumf %14, %18 : vector<8x1xf32>
    %cst_5 = arith.constant 1.000000e-16 : f32
    %20 = vector.broadcast %cst_5 : f32 to vector<8x1xf32>
    %21 = arith.maximumf %17, %20 : vector<8x1xf32>
    %22 = arith.mulf %19, %21 : vector<8x1xf32>
    %23 = math.rsqrt %22 : vector<8x1xf32>
    %24 = arith.mulf %11, %23 : vector<8x1xf32>
    %cst_6 = arith.constant 0.000000e+00 : f32
    %25 = vector.broadcast %cst_6 : f32 to vector<8x1xf32>
    %26 = arith.subf %25, %24 : vector<8x1xf32>
    %c0_7 = arith.constant 0 : index
    %c0_8 = arith.constant 0 : index
    %27 = vector.load %arg2[%c0_7, %c0_8] : memref<8x1xf32, #tpu.memory_space<vmem>>, vector<8x1xf32>
    tpu.vector_store %arg2[%c0_7, %c0_8], %26 {strides = array<i32>} : memref<8x1xf32, #tpu.memory_space<vmem>>, vector<8x1xf32>,
    return
  }
  func.func @transform_0(%arg0: i32) -> (i32, i32) {
    %c0_i32 = arith.constant 0 : i32
    %c0_i32_0 = arith.constant 0 : i32
    return %arg0, %c0_i32 : i32, i32
  }
  func.func @transform_1(%arg0: i32) -> (i32, i32) {
    %c0_i32 = arith.constant 0 : i32
    %c0_i32_0 = arith.constant 0 : i32
    return %arg0, %c0_i32 : i32, i32
  }
}

</mosaic_0001>

<bundles_post_ra>
// kernel: model_forward.1
= control target key start
LH: loop header
LB: loop body
LE: loop exit
PB: predicated region body
PF: predicated region fallthrough
CT: control target
= control target key end

     0   :  { %s62_s8 = smov 96   ;;  %s63_s9 = smov 64   ;;  %vm21_vm0 = vcmask 261120   ;;  %vm52_vm4 = vcmask 7168   ;;  %s80_s0 = inlined_call_operand.vmem [shape: f32[8,96], index: 0, kind: input, shape index: {}]   ;;  %s81_s1 = inlined_call_operand.vmem [shape: f32[8,1], index: 1, kind: output, shape index: {}]  }
   0x1   :  { %v8_v0 = vld [vmem:[%s80_s0] sm:$0xff] }
   0x2   :  { %10 = vrot.lane.b32.xlu0 %v8_v0, %s62_s8  ;;  %17 = vrot.lane.b32.xlu1 %v8_v0, %s63_s9  ;;  %v29_v1 = vmul.f32 %v8_v0, %v8_v0 }
   0xa   :  { %31 = vrot.lane.b32.xlu0 %v29_v1, %s63_s9 }
  0x74   :  { %v11_v2 = vpop.permute.xlu0 %10  ;;  %v18_v10 = vpop.permute.xlu1 %17 }
  0x75   :  { %v13_v3 = vsub.f32 %v8_v0, %v11_v2 }
  0x77   :  { %v14_v4 = vmul.f32 %v13_v3, %v13_v3 }
  0x79   :  { %v15_v5 = vmul.f32 0.0009765625, %v14_v4 }
  0x7b   :  { %v16_v6 = vadd.f32 %v15_v5, %v11_v2 }
  0x7c   :  { %v32_v7 = vpop.permute.xlu0 %31 }
  0x7d   :  { %v34_v8 = vsel %vm21_vm0, %v32_v7, 0.0  ;;  %v25_v9 = vmul.f32 %v16_v6, %v16_v6  ;;  %v20_v12 = vmul.f32 %v18_v10, %v16_v6 }
  0x7e   :  { %35 = vadd.xlane.f32.xlu2 %v34_v8 }
  0x7f   :  { %v26_v11 = vsel %vm21_vm0, %v25_v9, 0.0  ;;  %v22_v13 = vsel %vm21_vm0, %v20_v12, 0.0 }
  0x80   :  { %27 = vadd.xlane.f32.xlu1 %v26_v11 }
  0x86   :  { %23 = vadd.xlane.f32.xlu2 %v22_v13 }
  0xf1   :  { %v36_v14 = vpop.xlane.xlu2 %35 }
  0xf2   :  { %v38_v15 = vmax.f32 %v36_v14, 1e-16 }
  0xf3   :  { %v28_v16 = vpop.xlane.xlu1 %27 }
  0xf4   :  { %v37_v17 = vmax.f32 %v28_v16, 1e-16 }
  0xf6   :  { %v39_v18 = vmul.f32 %v38_v15, %v37_v17 }
  0xf8   :  { %60 = vrsqrt.f32 %v39_v18  ;;  %vm46_vm2 = vweird.f32 %v39_v18 }
  0xf9   :  { %v24_v26 = vpop.xlane.xlu2 %23 }
  0xfe   :  { %v61_v19 = vpop.eup %60 }
  0xff   :  { %v41_v20 = vmul.f32 %v61_v19, %v39_v18  ;;  %vm47_vm1 = vweird.f32 %v61_v19 }
 0x100   :  { %vm48_vm3 = vmor %vm46_vm2, %vm47_vm1 }
 0x101   :  { %v42_v21 = vmul.f32 %v61_v19, %v41_v20 }
 0x103   :  { %v43_v22 = vmul.f32 0.5, %v42_v21 }
 0x105   :  { %v44_v23 = vsub.f32 1.5, %v43_v22 }
 0x107   :  { %v45_v24 = vmul.f32 %v61_v19, %v44_v23 }
 0x109   :  { %v49_v25 = vsel %vm48_vm3, %v61_v19, %v45_v24 }
 0x10a   :  { %v50_v27 = vmul.f32 %v49_v25, %v24_v26 }
 0x10c   :  { %v51_v28 = vsub.f32 0.0, %v50_v27 }
 0x10e   :  { %53 = vst.msk [vmem:[%s81_s1] sm:$0xff] %vm52_vm4, %v51_v28 }

</bundles_post_ra>
